<compile_context>
chip_gen: v6e
topology: v6e:2x2x1
jax: 0.10.0
libtpu: 0.0.40
codegen_flags: <defaults>
</compile_context>

<pallas_src>
import jax
import jax.numpy as jnp
from jax.experimental import pallas as pl
from jax.experimental.pallas import tpu as pltpu


def conv1x1_kernel(w_ref, x_ref, o_ref):
    # w_ref: (C_out, C_in)    bf16  (natural PyTorch OI layout, resident)
    # x_ref: (N, C_in, HW)    f32   (cast to bf16 in-kernel; no wrapper cast pass)
    # o_ref: (N, C_out, HW)   f32   (f32 MXU accumulation, module output dtype)
    w = w_ref[...]
    n_batches = x_ref.shape[0]
    for n in range(n_batches):  # static unroll; single dot for N == 1
        x_bf16 = x_ref[n].astype(jnp.bfloat16)
        o_ref[n] = jnp.dot(w, x_bf16, preferred_element_type=jnp.float32)


def prepare_weight(weight_oihw):
    """(C_out, C_in, 1, 1) OIHW -> (C_out, C_in) bf16. Done once, outside the hot path."""
    c_out, c_in = weight_oihw.shape[0], weight_oihw.shape[1]
    return weight_oihw.reshape(c_out, c_in).astype(jnp.bfloat16)


def conv2d_1x1(x_nchw, w_co_ci):
    """1x1 stride-1 conv, no bias, computed as W @ X in a single grid step.

    x_nchw:  (N, C_in, H, W) float32
    w_co_ci: (C_out, C_in)   bfloat16 (from prepare_weight)
    returns: (N, C_out, H, W) float32
    """
    N, C_in, H, W = x_nchw.shape
    C_out = w_co_ci.shape[0]
    HW = H * W

    # NCHW -> (N, C_in, H*W): contiguous reshape, a bitcast (no HBM pass, no cast).
    x_f32 = x_nchw.reshape(N, C_in, HW)

    cost = pl.CostEstimate(
        flops=2 * N * C_out * C_in * HW,
        transcendentals=0,
        bytes_accessed=(x_f32.size * 4          # x read as f32
                        + w_co_ci.size * 2      # bf16 weight
                        + N * C_out * HW * 4),  # f32 output
    )

    out = pl.pallas_call(
        conv1x1_kernel,
        out_shape=jax.ShapeDtypeStruct((N, C_out, HW), jnp.float32),
        grid_spec=pltpu.PrefetchScalarGridSpec(
            num_scalar_prefetch=0,
            grid=(1,),  # one step: whole problem (<2 MB) fits VMEM on v5e/v6e/v7x
            in_specs=[
                pl.BlockSpec((C_out, C_in), lambda i: (0, 0)),     # weight resident
                pl.BlockSpec((N, C_in, HW), lambda i: (0, 0, 0)),  # all batches at once
            ],
            out_specs=pl.BlockSpec((N, C_out, HW), lambda i: (0, 0, 0)),
        ),
        compiler_params=pltpu.CompilerParams(
            dimension_semantics=("arbitrary",),
        ),
        cost_estimate=cost,
    )(w_co_ci, x_f32)

    # (N, C_out, H*W) -> (N, C_out, H, W): contiguous reshape (free).
    return out.reshape(N, C_out, H, W)


if __name__ == "__main__":
    key = jax.random.PRNGKey(0)
    kx, kw = jax.random.split(key)

    # Shapes implied by the module's forward: x209 is [1, 768, 12, 12].
    N, C_in, H, W = 1, 768, 12, 12
    C_out = 192

    x = jax.random.normal(kx, (N, C_in, H, W), dtype=jnp.float32)
    # Deterministic synthetic weights (Conv2d OIHW layout, kernel 1x1, no bias).
    weight = jax.random.normal(kw, (C_out, C_in, 1, 1), dtype=jnp.float32) * 0.02

    w_prep = prepare_weight(weight)        # pre-cast / pre-reshaped once
    conv = jax.jit(conv2d_1x1)

    out = conv(x, w_prep)
    out = jax.block_until_ready(out)

    assert out.shape == (N, C_out, H, W), out.shape
    assert out.dtype == jnp.float32, out.dtype

    # Cross-check against XLA's conv using the same bf16 operands / f32 accumulation.
    ref = jax.lax.conv_general_dilated(
        x.astype(jnp.bfloat16), weight.astype(jnp.bfloat16),
        window_strides=(1, 1), padding="VALID",
        dimension_numbers=("NCHW", "OIHW", "NCHW"),
        preferred_element_type=jnp.float32,
    )
    assert jnp.allclose(out, ref, atol=1e-2, rtol=1e-2)

    print("KERNEL_OK")
</pallas_src>

<mosaic_0001>
module attributes {stable_mosaic.version = 11 : i64} {
  func.func @conv1x1_kernel(%arg0: i32, %arg1: memref<192x768xbf16, #tpu.memory_space<vmem>>, %arg2: memref<1x768x144xf32, #tpu.memory_space<vmem>>, %arg3: memref<1x192x144xf32, #tpu.memory_space<vmem>>) attributes {dimension_semantics = [#tpu.dimension_semantics<arbitrary>], iteration_bounds = array<i64: 1>, scalar_prefetch = 0 : i64, scratch_operands = 0 : i64, tpu.core_type = #tpu.core_type<tc>, window_params = [{pipeline_mode = #tpu.pipeline_mode<synchronous>, transform_indices = @transform_0, window_bounds = array<i64: 192, 768>}, {pipeline_mode = #tpu.pipeline_mode<synchronous>, transform_indices = @transform_1, window_bounds = array<i64: 1, 768, 144>}, {pipeline_mode = #tpu.pipeline_mode<synchronous>, transform_indices = @transform_2, window_bounds = array<i64: 1, 192, 144>}]} {
    %c0 = arith.constant 0 : index
    %c0_0 = arith.constant 0 : index
    %0 = vector.load %arg1[%c0, %c0_0] : memref<192x768xbf16, #tpu.memory_space<vmem>>, vector<192x768xbf16>
    %c0_1 = arith.constant 0 : index
    %c0_2 = arith.constant 0 : index
    %c0_3 = arith.constant 0 : index
    %1 = vector.load %arg2[%c0_1, %c0_2, %c0_3] : memref<1x768x144xf32, #tpu.memory_space<vmem>>, vector<1x768x144xf32>
    %2 = vector.shape_cast %1 : vector<1x768x144xf32> to vector<768x144xf32>
    %3 = arith.truncf %2 : vector<768x144xf32> to vector<768x144xbf16>
    %cst = arith.constant dense<0.000000e+00> : vector<192x144xf32>
    %4 = tpu.matmul %0, %3, %cst {dimension_numbers = #tpu.dot_dimension_numbers<[1], [0], [0], [1], [0, 0, 1, 1], [], []>} : vector<192x768xbf16>, vector<768x144xbf16>, vector<192x144xf32> -> vector<192x144xf32>
    %c0_4 = arith.constant 0 : index
    %c0_5 = arith.constant 0 : index
    %c0_6 = arith.constant 0 : index
    %5 = vector.load %arg3[%c0_4, %c0_5, %c0_6] : memref<1x192x144xf32, #tpu.memory_space<vmem>>, vector<1x192x144xf32>
    %6 = vector.shape_cast %5 : vector<1x192x144xf32> to vector<192x144xf32>
    %7 = vector.shape_cast %4 : vector<192x144xf32> to vector<1x192x144xf32>
    tpu.vector_store %arg3[%c0_4, %c0_5, %c0_6], %7 {strides = array<i32>} : memref<1x192x144xf32, #tpu.memory_space<vmem>>, vector<1x192x144xf32>,
    return
  }
  func.func @transform_0(%arg0: i32) -> (i32, i32) {
    %c0_i32 = arith.constant 0 : i32
    %c0_i32_0 = arith.constant 0 : i32
    %c0_i32_1 = arith.constant 0 : i32
    return %c0_i32, %c0_i32_0 : i32, i32
  }
  func.func @transform_1(%arg0: i32) -> (i32, i32, i32) {
    %c0_i32 = arith.constant 0 : i32
    %c0_i32_0 = arith.constant 0 : i32
    %c0_i32_1 = arith.constant 0 : i32
    %c0_i32_2 = arith.constant 0 : i32
    return %c0_i32, %c0_i32_0, %c0_i32_1 : i32, i32, i32
  }
  func.func @transform_2(%arg0: i32) -> (i32, i32, i32) {
    %c0_i32 = arith.constant 0 : i32
    %c0_i32_0 = arith.constant 0 : i32
    %c0_i32_1 = arith.constant 0 : i32
    %c0_i32_2 = arith.constant 0 : i32
    return %c0_i32, %c0_i32_0, %c0_i32_1 : i32, i32, i32
  }
}

</mosaic_0001>

<bundles_post_ra>
// kernel: conv2d_1x1.1
= control target key start
LH: loop header
LB: loop body
LE: loop exit
PB: predicated region body
PF: predicated region fallthrough
CT: control target
= control target key end

     0   :  { %vm1191_vm0 = vcmask 130048   ;;  %s2622_s1 = inlined_call_operand.vmem [shape: f32[1,768,144], index: 1, kind: input, shape index: {}]   ;;  %s2623_s0 = inlined_call_operand.vmem [shape: bf16[192,768], index: 0, kind: input, shape index: {}]   ;;  %s2624_s2 = inlined_call_operand.vmem [shape: f32[1,192,144], index: 2, kind: output, shape index: {}]  }
   0x1   :  { %v112_v0 = vld [vmem:[%s2622_s1 + $0xe8] sm:$0xff]  ;;  %v114_v1 = vld [vmem:[%s2622_s1 + $0xf8] sm:$0xff]  ;;  %v111_v5 = vld [vmem:[%s2622_s1 + $0xe0] sm:$0xff] }
   0x2   :  { %v176_v2 = vld [vmem:[%s2622_s1 + $0x2e8] sm:$0xff]  ;;  %v290_v3 = vpack.c.bf16 %v114_v1, %v112_v0  ;;  %v178_v4 = vld [vmem:[%s2622_s1 + $0x2f8] sm:$0xff]  ;;  %v113_v6 = vld [vmem:[%s2622_s1 + $0xf0] sm:$0xff] }
   0x3   :  { %v322_v7 = vpack.c.bf16 %v178_v4, %v176_v2  ;;  %v289_v8 = vpack.c.bf16 %v113_v6, %v111_v5  ;;  %v175_v9 = vld [vmem:[%s2622_s1 + $0x2e0] sm:$0xff]  ;;  %v177_v10 = vld [vmem:[%s2622_s1 + $0x2f0] sm:$0xff]  ;;  %v108_v11 = vld [vmem:[%s2622_s1 + $0xc8] sm:$0xff] }
   0x4   :  { %731 = vmatprep.subr.bf16.mxu0 %v290_v3  ;;  %v321_v12 = vpack.c.bf16 %v177_v10, %v175_v9  ;;  %v110_v13 = vld [vmem:[%s2622_s1 + $0xd8] sm:$0xff]  ;;  %v172_v14 = vld [vmem:[%s2622_s1 + $0x2c8] sm:$0xff]  ;;  %v107_v18 = vld [vmem:[%s2622_s1 + $0xc0] sm:$0xff] }
   0x5   :  { %v174_v15 = vld [vmem:[%s2622_s1 + $0x2d8] sm:$0xff]  ;;  %884 = vmatprep.subr.bf16.mxu1 %v322_v7  ;;  %732 = vmatpush1.bf16.msra.mxu0 %v289_v8  ;;  %v288_v16 = vpack.c.bf16 %v110_v13, %v108_v11  ;;  %v109_v19 = vld [vmem:[%s2622_s1 + $0xd0] sm:$0xff]  ;;  %v171_v20 = vld [vmem:[%s2622_s1 + $0x2c0] sm:$0xff] }
   0x6   :  { %v320_v17 = vpack.c.bf16 %v174_v15, %v172_v14  ;;  %885 = vmatpush1.bf16.msra.mxu1 %v321_v12  ;;  %v287_v21 = vpack.c.bf16 %v109_v19, %v107_v18  ;;  %v173_v22 = vld [vmem:[%s2622_s1 + $0x2d0] sm:$0xff]  ;;  %v104_v23 = vld [vmem:[%s2622_s1 + $0xa8] sm:$0xff]  ;;  %v106_v24 = vld [vmem:[%s2622_s1 + $0xb8] sm:$0xff] }
   0x7   :  { %733 = vmatprep.subr.bf16.mxu0 %v288_v16  ;;  %v319_v25 = vpack.c.bf16 %v173_v22, %v171_v20  ;;  %v286_v26 = vpack.c.bf16 %v106_v24, %v104_v23  ;;  %v168_v27 = vld [vmem:[%s2622_s1 + $0x2a8] sm:$0xff]  ;;  %v170_v28 = vld [vmem:[%s2622_s1 + $0x2b8] sm:$0xff]  ;;  %v103_v29 = vld [vmem:[%s2622_s1 + $0xa0] sm:$0xff] }
   0x8   :  { %886 = vmatprep.subr.bf16.mxu1 %v320_v17  ;;  %v318_v30 = vpack.c.bf16 %v170_v28, %v168_v27  ;;  %v105_v31 = vld [vmem:[%s2622_s1 + $0xb0] sm:$0xff]  ;;  %v167_v32 = vld [vmem:[%s2622_s1 + $0x2a0] sm:$0xff]  ;;  %v100_v35 = vld [vmem:[%s2622_s1 + $0x88] sm:$0xff] }
   0x9   :  { %v169_v33 = vld [vmem:[%s2622_s1 + $0x2b0] sm:$0xff]  ;;  %734 = vmatpush1.bf16.msra.mxu0 %v287_v21  ;;  %v285_v34 = vpack.c.bf16 %v105_v31, %v103_v29  ;;  %v102_v36 = vld [vmem:[%s2622_s1 + $0x98] sm:$0xff]  ;;  %v164_v37 = vld [vmem:[%s2622_s1 + $0x288] sm:$0xff] }
   0xa   :  { %887 = vmatpush1.bf16.msra.mxu1 %v319_v25  ;;  %735 = vmatprep.subr.bf16.mxu0 %v286_v26  ;;  %v317_v38 = vpack.c.bf16 %v169_v33, %v167_v32  ;;  %v284_v39 = vpack.c.bf16 %v102_v36, %v100_v35  ;;  %v166_v40 = vld [vmem:[%s2622_s1 + $0x298] sm:$0xff]  ;;  %v99_v41 = vld [vmem:[%s2622_s1 + $0x80] sm:$0xff]  ;;  %v101_v42 = vld [vmem:[%s2622_s1 + $0x90] sm:$0xff] }
   0xb   :  { %888 = vmatprep.subr.bf16.mxu1 %v318_v30  ;;  %v316_v43 = vpack.c.bf16 %v166_v40, %v164_v37  ;;  %v163_v44 = vld [vmem:[%s2622_s1 + $0x280] sm:$0xff]  ;;  %v165_v45 = vld [vmem:[%s2622_s1 + $0x290] sm:$0xff]  ;;  %v96_v46 = vld [vmem:[%s2622_s1 + $0x68] sm:$0xff]  ;;  %v283_v50 = vpack.c.bf16 %v101_v42, %v99_v41 }
   0xc   :  { %v98_v47 = vld [vmem:[%s2622_s1 + $0x78] sm:$0xff]  ;;  %v160_v48 = vld [vmem:[%s2622_s1 + $0x268] sm:$0xff]  ;;  %v315_v51 = vpack.c.bf16 %v165_v45, %v163_v44  ;;  %v95_v53 = vld [vmem:[%s2622_s1 + $0x60] sm:$0xff] }
   0xd   :  { %v162_v49 = vld [vmem:[%s2622_s1 + $0x278] sm:$0xff]  ;;  %736 = vmatpush1.bf16.msra.mxu0 %v285_v34  ;;  %v282_v52 = vpack.c.bf16 %v98_v47, %v96_v46  ;;  %v97_v54 = vld [vmem:[%s2622_s1 + $0x70] sm:$0xff]  ;;  %v159_v55 = vld [vmem:[%s2622_s1 + $0x260] sm:$0xff] }
   0xe   :  { %889 = vmatpush1.bf16.msra.mxu1 %v317_v38  ;;  %737 = vmatprep.subr.bf16.mxu0 %v284_v39  ;;  %v314_v56 = vpack.c.bf16 %v162_v49, %v160_v48  ;;  %v161_v57 = vld [vmem:[%s2622_s1 + $0x270] sm:$0xff]  ;;  %v92_v58 = vld [vmem:[%s2622_s1 + $0x48] sm:$0xff]  ;;  %v94_v59 = vld [vmem:[%s2622_s1 + $0x58] sm:$0xff]  ;;  %v281_v62 = vpack.c.bf16 %v97_v54, %v95_v53 }
   0xf   :  { %890 = vmatprep.subr.bf16.mxu1 %v316_v43  ;;  %v156_v60 = vld [vmem:[%s2622_s1 + $0x248] sm:$0xff]  ;;  %v158_v61 = vld [vmem:[%s2622_s1 + $0x258] sm:$0xff]  ;;  %v313_v63 = vpack.c.bf16 %v161_v57, %v159_v55  ;;  %v280_v0 = vpack.c.bf16 %v94_v59, %v92_v58  ;;  %v91_v1 = vld [vmem:[%s2622_s1 + $0x40] sm:$0xff] }
  0x10   :  { %v93_v2 = vld [vmem:[%s2622_s1 + $0x50] sm:$0xff]  ;;  %v155_v3 = vld [vmem:[%s2622_s1 + $0x240] sm:$0xff]  ;;  %v312_v4 = vpack.c.bf16 %v158_v61, %v156_v60  ;;  %v88_v6 = vld [vmem:[%s2622_s1 + $0x28] sm:$0xff] }
  0x11   :  { %738 = vmatpush1.bf16.msra.mxu0 %v283_v50  ;;  %v157_v5 = vld [vmem:[%s2622_s1 + $0x250] sm:$0xff]  ;;  %v90_v7 = vld [vmem:[%s2622_s1 + $0x38] sm:$0xff]  ;;  %v152_v8 = vld [vmem:[%s2622_s1 + $0x228] sm:$0xff]  ;;  %v279_v10 = vpack.c.bf16 %v93_v2, %v91_v1 }
  0x12   :  { %891 = vmatpush1.bf16.msra.mxu1 %v315_v51  ;;  %739 = vmatprep.subr.bf16.mxu0 %v282_v52  ;;  %v154_v9 = vld [vmem:[%s2622_s1 + $0x238] sm:$0xff]  ;;  %v311_v11 = vpack.c.bf16 %v157_v5, %v155_v3  ;;  %v278_v12 = vpack.c.bf16 %v90_v7, %v88_v6  ;;  %v87_v13 = vld [vmem:[%s2622_s1 + $0x20] sm:$0xff]  ;;  %v89_v14 = vld [vmem:[%s2622_s1 + $0x30] sm:$0xff] }
  0x13   :  { %892 = vmatprep.subr.bf16.mxu1 %v314_v56  ;;  %v151_v15 = vld [vmem:[%s2622_s1 + $0x220] sm:$0xff]  ;;  %v310_v16 = vpack.c.bf16 %v154_v9, %v152_v8  ;;  %v153_v17 = vld [vmem:[%s2622_s1 + $0x230] sm:$0xff]  ;;  %v84_v18 = vld [vmem:[%s2622_s1 + $0x8] sm:$0xff]  ;;  %v277_v22 = vpack.c.bf16 %v89_v14, %v87_v13 }
  0x14   :  { %v86_v19 = vld [vmem:[%s2622_s1 + $0x18] sm:$0xff]  ;;  %v148_v20 = vld [vmem:[%s2622_s1 + $0x208] sm:$0xff]  ;;  %v309_v23 = vpack.c.bf16 %v153_v17, %v151_v15  ;;  %v83_v25 = vld [vmem:[%s2622_s1] sm:$0xff] }
  0x15   :  { %740 = vmatpush1.bf16.msra.mxu0 %v281_v62  ;;  %v150_v21 = vld [vmem:[%s2622_s1 + $0x218] sm:$0xff]  ;;  %v276_v24 = vpack.c.bf16 %v86_v19, %v84_v18  ;;  %v85_v26 = vld [vmem:[%s2622_s1 + $0x10] sm:$0xff]  ;;  %v147_v27 = vld [vmem:[%s2622_s1 + $0x200] sm:$0xff] }
  0x16   :  { %893 = vmatpush1.bf16.msra.mxu1 %v313_v63  ;;  %741 = vmatprep.subr.bf16.mxu0 %v280_v0  ;;  %v308_v28 = vpack.c.bf16 %v150_v21, %v148_v20  ;;  %v149_v29 = vld [vmem:[%s2622_s1 + $0x210] sm:$0xff]  ;;  %v144_v30 = vld [vmem:[%s2622_s1 + $0x1e8] sm:$0xff]  ;;  %v146_v31 = vld [vmem:[%s2622_s1 + $0x1f8] sm:$0xff]  ;;  %v275_v34 = vpack.c.bf16 %v85_v26, %v83_v25 }
  0x17   :  { %894 = vmatprep.subr.bf16.mxu1 %v312_v4  ;;  %v208_v32 = vld [vmem:[%s2622_s1 + $0x3e8] sm:$0xff]  ;;  %v210_v33 = vld [vmem:[%s2622_s1 + $0x3f8] sm:$0xff]  ;;  %v307_v35 = vpack.c.bf16 %v149_v29, %v147_v27  ;;  %v306_v36 = vpack.c.bf16 %v146_v31, %v144_v30  ;;  %v143_v37 = vld [vmem:[%s2622_s1 + $0x1e0] sm:$0xff] }
  0x18   :  { %v145_v38 = vld [vmem:[%s2622_s1 + $0x1f0] sm:$0xff]  ;;  %v207_v39 = vld [vmem:[%s2622_s1 + $0x3e0] sm:$0xff]  ;;  %v338_v40 = vpack.c.bf16 %v210_v33, %v208_v32  ;;  %v140_v42 = vld [vmem:[%s2622_s1 + $0x1c8] sm:$0xff] }
  0x19   :  { %742 = vmatpush1.bf16.msra.mxu0 %v279_v10  ;;  %v209_v41 = vld [vmem:[%s2622_s1 + $0x3f0] sm:$0xff]  ;;  %v142_v43 = vld [vmem:[%s2622_s1 + $0x1d8] sm:$0xff]  ;;  %v204_v44 = vld [vmem:[%s2622_s1 + $0x3c8] sm:$0xff]  ;;  %v305_v46 = vpack.c.bf16 %v145_v38, %v143_v37 }
  0x1a   :  { %895 = vmatpush1.bf16.msra.mxu1 %v311_v11  ;;  %743 = vmatprep.subr.bf16.mxu0 %v278_v12  ;;  %v206_v45 = vld [vmem:[%s2622_s1 + $0x3d8] sm:$0xff]  ;;  %v337_v47 = vpack.c.bf16 %v209_v41, %v207_v39  ;;  %v304_v48 = vpack.c.bf16 %v142_v43, %v140_v42  ;;  %v139_v49 = vld [vmem:[%s2622_s1 + $0x1c0] sm:$0xff]  ;;  %v141_v50 = vld [vmem:[%s2622_s1 + $0x1d0] sm:$0xff] }
  0x1b   :  { %896 = vmatprep.subr.bf16.mxu1 %v310_v16  ;;  %v203_v51 = vld [vmem:[%s2622_s1 + $0x3c0] sm:$0xff]  ;;  %v336_v52 = vpack.c.bf16 %v206_v45, %v204_v44  ;;  %v205_v53 = vld [vmem:[%s2622_s1 + $0x3d0] sm:$0xff]  ;;  %v136_v54 = vld [vmem:[%s2622_s1 + $0x1a8] sm:$0xff]  ;;  %v303_v58 = vpack.c.bf16 %v141_v50, %v139_v49 }
  0x1c   :  { %v138_v55 = vld [vmem:[%s2622_s1 + $0x1b8] sm:$0xff]  ;;  %v200_v56 = vld [vmem:[%s2622_s1 + $0x3a8] sm:$0xff]  ;;  %v335_v59 = vpack.c.bf16 %v205_v53, %v203_v51  ;;  %v135_v61 = vld [vmem:[%s2622_s1 + $0x1a0] sm:$0xff] }
  0x1d   :  { %744 = vmatpush1.bf16.msra.mxu0 %v277_v22  ;;  %v202_v57 = vld [vmem:[%s2622_s1 + $0x3b8] sm:$0xff]  ;;  %v302_v60 = vpack.c.bf16 %v138_v55, %v136_v54  ;;  %v137_v62 = vld [vmem:[%s2622_s1 + $0x1b0] sm:$0xff]  ;;  %v199_v63 = vld [vmem:[%s2622_s1 + $0x3a0] sm:$0xff] }
  0x1e   :  { %897 = vmatpush1.bf16.msra.mxu1 %v309_v23  ;;  %745 = vmatprep.subr.bf16.mxu0 %v276_v24  ;;  %v334_v0 = vpack.c.bf16 %v202_v57, %v200_v56  ;;  %v201_v1 = vld [vmem:[%s2622_s1 + $0x3b0] sm:$0xff]  ;;  %v132_v2 = vld [vmem:[%s2622_s1 + $0x188] sm:$0xff]  ;;  %v134_v3 = vld [vmem:[%s2622_s1 + $0x198] sm:$0xff]  ;;  %v301_v6 = vpack.c.bf16 %v137_v62, %v135_v61 }
  0x1f   :  { %898 = vmatprep.subr.bf16.mxu1 %v308_v28  ;;  %v196_v4 = vld [vmem:[%s2622_s1 + $0x388] sm:$0xff]  ;;  %v198_v5 = vld [vmem:[%s2622_s1 + $0x398] sm:$0xff]  ;;  %v131_v7 = vld [vmem:[%s2622_s1 + $0x180] sm:$0xff]  ;;  %v333_v10 = vpack.c.bf16 %v201_v1, %v199_v63  ;;  %v300_v11 = vpack.c.bf16 %v134_v3, %v132_v2 }
  0x20   :  { %v133_v8 = vld [vmem:[%s2622_s1 + $0x190] sm:$0xff]  ;;  %v195_v9 = vld [vmem:[%s2622_s1 + $0x380] sm:$0xff]  ;;  %v128_v13 = vld [vmem:[%s2622_s1 + $0x168] sm:$0xff]  ;;  %v332_v15 = vpack.c.bf16 %v198_v5, %v196_v4 }
  0x21   :  { %746 = vmatpush1.bf16.msra.mxu0 %v275_v34  ;;  %v197_v12 = vld [vmem:[%s2622_s1 + $0x390] sm:$0xff]  ;;  %v130_v14 = vld [vmem:[%s2622_s1 + $0x178] sm:$0xff]  ;;  %v192_v16 = vld [vmem:[%s2622_s1 + $0x368] sm:$0xff]  ;;  %v299_v20 = vpack.c.bf16 %v133_v8, %v131_v7 }
  0x22   :  { %899 = vmatpush1.bf16.msra.mxu1 %v307_v35  ;;  %747 = vmatprep.subr.bf16.mxu0 %v306_v36  ;;  %v194_v17 = vld [vmem:[%s2622_s1 + $0x378] sm:$0xff]  ;;  %v127_v18 = vld [vmem:[%s2622_s1 + $0x160] sm:$0xff]  ;;  %v129_v21 = vld [vmem:[%s2622_s1 + $0x170] sm:$0xff]  ;;  %v331_v22 = vpack.c.bf16 %v197_v12, %v195_v9  ;;  %v298_v23 = vpack.c.bf16 %v130_v14, %v128_v13 }
  0x23   :  { %900 = vmatprep.subr.bf16.mxu1 %v338_v40  ;;  %v1349_v19 = vld [vmem:[%s2623_s0 + $0x4] ss:$24 sps:$4 sm:$0xff]   ;;  %v193_v25 = vld [vmem:[%s2622_s1 + $0x370] sm:$0xff]  ;;  %v330_v27 = vpack.c.bf16 %v194_v17, %v192_v16  ;;  %v124_v28 = vld [vmem:[%s2622_s1 + $0x148] sm:$0xff]  ;;  %v297_v32 = vpack.c.bf16 %v129_v21, %v127_v18 }
  0x24   :  { %v191_v24 = vld [vmem:[%s2622_s1 + $0x360] sm:$0xff]  ;;  %v126_v29 = vld [vmem:[%s2622_s1 + $0x158] sm:$0xff]  ;;  %v188_v30 = vld [vmem:[%s2622_s1 + $0x348] sm:$0xff]  ;;  %763 = vmatprep.mubr.bf16.mxu0 %v1349_v19 }
  0x25   :  { %748 = vmatpush2.bf16.msra.mxu0 %v305_v46  ;;  %v1352_v26 = vld [vmem:[%s2623_s0 + $0xc] ss:$24 sps:$4 sm:$0xff]   ;;  %v190_v31 = vld [vmem:[%s2622_s1 + $0x358] sm:$0xff]  ;;  %v329_v33 = vpack.c.bf16 %v193_v25, %v191_v24  ;;  %v296_v34 = vpack.c.bf16 %v126_v29, %v124_v28  ;;  %v125_v36 = vld [vmem:[%s2622_s1 + $0x150] sm:$0xff] }
  0x26   :  { %901 = vmatpush2.bf16.msra.mxu1 %v337_v47  ;;  %749 = vmatprep.subr.bf16.mxu0 %v304_v48  ;;  %v123_v35 = vld [vmem:[%s2622_s1 + $0x140] sm:$0xff]  ;;  %v328_v38 = vpack.c.bf16 %v190_v31, %v188_v30  ;;  %v189_v39 = vld [vmem:[%s2622_s1 + $0x350] sm:$0xff]  ;;  %v120_v40 = vld [vmem:[%s2622_s1 + $0x128] sm:$0xff] }
  0x27   :  { %902 = vmatprep.subr.bf16.mxu1 %v336_v52  ;;  %916 = vmatprep.mubr.bf16.mxu1 %v1352_v26  ;;  %v187_v37 = vld [vmem:[%s2622_s1 + $0x340] sm:$0xff]  ;;  %v122_v41 = vld [vmem:[%s2622_s1 + $0x138] sm:$0xff]  ;;  %v184_v42 = vld [vmem:[%s2622_s1 + $0x328] sm:$0xff]  ;;  %v295_v45 = vpack.c.bf16 %v125_v36, %v123_v35 }
  0x28   :  { %v186_v43 = vld [vmem:[%s2622_s1 + $0x338] sm:$0xff]  ;;  %v119_v44 = vld [vmem:[%s2622_s1 + $0x120] sm:$0xff]  ;;  %v121_v46 = vld [vmem:[%s2622_s1 + $0x130] sm:$0xff]  ;;  %v327_v47 = vpack.c.bf16 %v189_v39, %v187_v37  ;;  %v294_v48 = vpack.c.bf16 %v122_v41, %v120_v40 }
  0x29   :  { %750 = vmatpush2.bf16.msra.mxu0 %v303_v58  ;;  %v183_v49 = vld [vmem:[%s2622_s1 + $0x320] sm:$0xff]  ;;  %v326_v50 = vpack.c.bf16 %v186_v43, %v184_v42  ;;  %v185_v51 = vld [vmem:[%s2622_s1 + $0x330] sm:$0xff]  ;;  %v116_v52 = vld [vmem:[%s2622_s1 + $0x108] sm:$0xff]  ;;  %v293_v57 = vpack.c.bf16 %v121_v46, %v119_v44 }
  0x2a   :  { %903 = vmatpush2.bf16.msra.mxu1 %v335_v59  ;;  %751 = vmatprep.subr.bf16.mxu0 %v302_v60  ;;  %v118_v53 = vld [vmem:[%s2622_s1 + $0x118] sm:$0xff]  ;;  %v180_v54 = vld [vmem:[%s2622_s1 + $0x308] sm:$0xff]  ;;  %v115_v56 = vld [vmem:[%s2622_s1 + $0x100] sm:$0xff]  ;;  %v325_v59 = vpack.c.bf16 %v185_v51, %v183_v49 }
  0x2b   :  { %904 = vmatprep.subr.bf16.mxu1 %v334_v0  ;;  %v182_v55 = vld [vmem:[%s2622_s1 + $0x318] sm:$0xff]  ;;  %v117_v58 = vld [vmem:[%s2622_s1 + $0x110] sm:$0xff]  ;;  %v292_v60 = vpack.c.bf16 %v118_v53, %v116_v52  ;;  %v179_v61 = vld [vmem:[%s2622_s1 + $0x300] sm:$0xff] }
  0x2c   :  { %v324_v62 = vpack.c.bf16 %v182_v55, %v180_v54  ;;  %v181_v63 = vld [vmem:[%s2622_s1 + $0x310] sm:$0xff]  ;;  %v240_v0 = vld [vmem:[%s2622_s1 + $0x4e8] sm:$0xff]  ;;  %v242_v1 = vld [vmem:[%s2622_s1 + $0x4f8] sm:$0xff]  ;;  %v291_v2 = vpack.c.bf16 %v117_v58, %v115_v56 }
  0x2d   :  { %752 = vmatpush2.bf16.msra.mxu0 %v301_v6  ;;  %v239_v3 = vld [vmem:[%s2622_s1 + $0x4e0] sm:$0xff]  ;;  %v323_v4 = vpack.c.bf16 %v181_v63, %v179_v61  ;;  %v354_v5 = vpack.c.bf16 %v242_v1, %v240_v0  ;;  %v241_v6 = vld [vmem:[%s2622_s1 + $0x4f0] sm:$0xff]  ;;  %v236_v7 = vld [vmem:[%s2622_s1 + $0x4c8] sm:$0xff] }
  0x2e   :  { %905 = vmatpush2.bf16.msra.mxu1 %v333_v10  ;;  %753 = vmatprep.subr.bf16.mxu0 %v300_v11  ;;  %v238_v8 = vld [vmem:[%s2622_s1 + $0x4d8] sm:$0xff]  ;;  %v1350_v10 = vld [vmem:[%s2623_s0 + $0x8] ss:$24 sps:$4 sm:$0xff]   ;;  %v353_v11 = vpack.c.bf16 %v241_v6, %v239_v3  ;;  %v1353_v12 = vld [vmem:[%s2623_s0 + $0x34] ss:$24 sps:$4 sm:$0xff]  }
  0x2f   :  { %906 = vmatprep.subr.bf16.mxu1 %v332_v15  ;;  %v1347_v9 = vld [vmem:[%s2623_s0] ss:$24 sps:$4 sm:$0xff]   ;;  %v237_v14 = vld [vmem:[%s2622_s1 + $0x4d0] sm:$0xff]  ;;  %v352_v15 = vpack.c.bf16 %v238_v8, %v236_v7  ;;  %v232_v16 = vld [vmem:[%s2622_s1 + $0x4a8] sm:$0xff] }
  0x30   :  { %v235_v13 = vld [vmem:[%s2622_s1 + $0x4c0] sm:$0xff]  ;;  %v234_v17 = vld [vmem:[%s2622_s1 + $0x4b8] sm:$0xff]  ;;  %v228_v24 = vld [vmem:[%s2622_s1 + $0x488] sm:$0xff] }
  0x31   :  { %754 = vmatpush2.bf16.msra.mxu0 %v299_v20  ;;  %v1355_v18 = vld [vmem:[%s2623_s0 + $0x3c] ss:$24 sps:$4 sm:$0xff]   ;;  %v351_v19 = vpack.c.bf16 %v237_v14, %v235_v13  ;;  %v231_v20 = vld [vmem:[%s2622_s1 + $0x4a0] sm:$0xff]  ;;  %v350_v21 = vpack.c.bf16 %v234_v17, %v232_v16  ;;  %v1358_v26 = vld [vmem:[%s2623_s0 + $0x38] ss:$24 sps:$4 sm:$0xff]  }
  0x32   :  { %907 = vmatpush2.bf16.msra.mxu1 %v331_v22  ;;  %755 = vmatprep.subr.bf16.mxu0 %v298_v23  ;;  %v233_v22 = vld [vmem:[%s2622_s1 + $0x4b0] sm:$0xff]  ;;  %v230_v25 = vld [vmem:[%s2622_s1 + $0x498] sm:$0xff]  ;;  %v1361_v29 = vld [vmem:[%s2623_s0 + $0x6c] ss:$24 sps:$4 sm:$0xff]  }
  0x33   :  { %908 = vmatprep.subr.bf16.mxu1 %v330_v27  ;;  %v1357_v23 = vld [vmem:[%s2623_s0 + $0x30] ss:$24 sps:$4 sm:$0xff]   ;;  %v349_v27 = vpack.c.bf16 %v233_v22, %v231_v20  ;;  %v1359_v28 = vld [vmem:[%s2623_s0 + $0x64] ss:$24 sps:$4 sm:$0xff]   ;;  %v1363_v36 = vld [vmem:[%s2623_s0 + $0x60] ss:$24 sps:$4 sm:$0xff]  }
  0x34   :  { %v227_v30 = vld [vmem:[%s2622_s1 + $0x480] sm:$0xff]  ;;  %v229_v31 = vld [vmem:[%s2622_s1 + $0x490] sm:$0xff]  ;;  %v220_v40 = vld [vmem:[%s2622_s1 + $0x448] sm:$0xff] }
  0x35   :  { %756 = vmatpush2.bf16.msra.mxu0 %v297_v32  ;;  %v224_v32 = vld [vmem:[%s2622_s1 + $0x468] sm:$0xff]  ;;  %v347_v35 = vpack.c.bf16 %v229_v31, %v227_v30  ;;  %v225_v39 = vld [vmem:[%s2622_s1 + $0x470] sm:$0xff]  ;;  %v222_v41 = vld [vmem:[%s2622_s1 + $0x458] sm:$0xff] }
  0x36   :  { %909 = vmatpush2.bf16.msra.mxu1 %v329_v33  ;;  %757 = vmatprep.subr.bf16.mxu0 %v296_v34  ;;  %v348_v33 = vpack.c.bf16 %v230_v25, %v228_v24  ;;  %v226_v34 = vld [vmem:[%s2622_s1 + $0x478] sm:$0xff]  ;;  %v1364_v42 = vld [vmem:[%s2623_s0 + $0x68] ss:$24 sps:$4 sm:$0xff]   ;;  %v1365_v43 = vld [vmem:[%s2623_s0 + $0x94] ss:$24 sps:$4 sm:$0xff]  }
  0x37   :  { %910 = vmatprep.subr.bf16.mxu1 %v328_v38  ;;  %v346_v37 = vpack.c.bf16 %v226_v34, %v224_v32  ;;  %v223_v38 = vld [vmem:[%s2622_s1 + $0x460] sm:$0xff]  ;;  %v1367_v44 = vld [vmem:[%s2623_s0 + $0x9c] ss:$24 sps:$4 sm:$0xff]   ;;  %v216_v49 = vld [vmem:[%s2622_s1 + $0x428] sm:$0xff] }
  0x38   :  { %v219_v46 = vld [vmem:[%s2622_s1 + $0x440] sm:$0xff]  ;;  %v1369_v51 = vld [vmem:[%s2623_s0 + $0x90] ss:$24 sps:$4 sm:$0xff]   ;;  %v214_v58 = vld [vmem:[%s2622_s1 + $0x418] sm:$0xff] }
  0x39   :  { %758 = vmatpush2.bf16.msra.mxu0 %v295_v45  ;;  %v345_v45 = vpack.c.bf16 %v225_v39, %v223_v38  ;;  %v1370_v53 = vld [vmem:[%s2623_s0 + $0x98] ss:$24 sps:$4 sm:$0xff]   ;;  %v215_v55 = vld [vmem:[%s2622_s1 + $0x420] sm:$0xff]  ;;  %v272_v1 = vld [vmem:[%s2622_s1 + $0x5e8] sm:$0xff] }
  0x3a   :  { %911 = vmatpush2.bf16.msra.mxu1 %v327_v47  ;;  %759 = vmatprep.subr.bf16.mxu0 %v294_v48  ;;  %v344_v47 = vpack.c.bf16 %v222_v41, %v220_v40  ;;  %v221_v48 = vld [vmem:[%s2622_s1 + $0x450] sm:$0xff]  ;;  %v211_v63 = vld [vmem:[%s2622_s1 + $0x400] sm:$0xff]  ;;  %v264_v17 = vld [vmem:[%s2622_s1 + $0x5a8] sm:$0xff] }
  0x3b   :  { %912 = vmatprep.subr.bf16.mxu1 %v326_v50  ;;  %v218_v50 = vld [vmem:[%s2622_s1 + $0x438] sm:$0xff]  ;;  %v343_v52 = vpack.c.bf16 %v221_v48, %v219_v46  ;;  %v217_v56 = vld [vmem:[%s2622_s1 + $0x430] sm:$0xff]  ;;  %v271_v7 = vld [vmem:[%s2622_s1 + $0x5e0] sm:$0xff] }
  0x3c   :  { %v342_v54 = vpack.c.bf16 %v218_v50, %v216_v49  ;;  %v341_v61 = vpack.c.bf16 %v217_v56, %v215_v55  ;;  %v213_v0 = vld [vmem:[%s2622_s1 + $0x410] sm:$0xff]  ;;  %v1375_v3 = vld [vmem:[%s2623_s0 + $0xc0] ss:$24 sps:$4 sm:$0xff]   ;;  %v1383_v25 = vld [vmem:[%s2623_s0 + $0x124] ss:$24 sps:$4 sm:$0xff]  }
  0x3d   :  { %760 = vmatpush2.bf16.msra.mxu0 %v293_v57  ;;  %v212_v57 = vld [vmem:[%s2622_s1 + $0x408] sm:$0xff]  ;;  %v273_v8 = vld [vmem:[%s2622_s1 + $0x5f0] sm:$0xff]  ;;  %v267_v14 = vld [vmem:[%s2622_s1 + $0x5c0] sm:$0xff] }
  0x3e   :  { %913 = vmatpush2.bf16.msra.mxu1 %v325_v59  ;;  %761 = vmatprep.subr.bf16.mxu0 %v292_v60  ;;  %v1371_v59 = vld [vmem:[%s2623_s0 + $0xc4] ss:$24 sps:$4 sm:$0xff]   ;;  %v369_v13 = vpack.c.bf16 %v273_v8, %v271_v7  ;;  %v269_v16 = vld [vmem:[%s2622_s1 + $0x5d0] sm:$0xff]  ;;  %v1387_v39 = vld [vmem:[%s2623_s0 + $0x120] ss:$24 sps:$4 sm:$0xff]  }
  0x3f   :  { %914 = vmatprep.subr.bf16.mxu1 %v324_v62  ;;  %v1373_v60 = vld [vmem:[%s2623_s0 + $0xcc] ss:$24 sps:$4 sm:$0xff]   ;;  %v340_v62 = vpack.c.bf16 %v214_v58, %v212_v57  ;;  %v367_v20 = vpack.c.bf16 %v269_v16, %v267_v14  ;;  %v1382_v22 = vld [vmem:[%s2623_s0 + $0xf8] ss:$24 sps:$4 sm:$0xff]  }
  0x40   :  { %v265_v24 = vld [vmem:[%s2622_s1 + $0x5b0] sm:$0xff]  ;;  %v259_v30 = vld [vmem:[%s2622_s1 + $0x580] sm:$0xff]  ;;  %v258_v34 = vld [vmem:[%s2622_s1 + $0x578] sm:$0xff] }
  0x41   :  { %762 = vmatpush2.bf16.msra.mxu0 %v291_v2  ;;  %v274_v2 = vld [vmem:[%s2622_s1 + $0x5f8] sm:$0xff]  ;;  %v261_v32 = vld [vmem:[%s2622_s1 + $0x590] sm:$0xff]  ;;  %v252_v40 = vld [vmem:[%s2622_s1 + $0x548] sm:$0xff] }
  0x42   :  { %915 = vmatpush2.bf16.msra.mxu1 %v323_v4  ;;  %1037 = vmatprep.subr.bf16.mxu0 %v354_v5  ;;  %v339_v4 = vpack.c.bf16 %v213_v0, %v211_v63  ;;  %v370_v6 = vpack.c.bf16 %v274_v2, %v272_v1  ;;  %v257_v38 = vld [vmem:[%s2622_s1 + $0x570] sm:$0xff]  ;;  %v254_v41 = vld [vmem:[%s2622_s1 + $0x558] sm:$0xff]  ;;  %v248_v49 = vld [vmem:[%s2622_s1 + $0x528] sm:$0xff] }
  0x43   :  { %1315 = vmatprep.subr.bf16.mxu1 %v354_v5  ;;  %v1376_v5 = vld [vmem:[%s2623_s0 + $0xc8] ss:$24 sps:$4 sm:$0xff]   ;;  %v360_v46 = vpack.c.bf16 %v254_v41, %v252_v40  ;;  %v253_v48 = vld [vmem:[%s2622_s1 + $0x550] sm:$0xff]  ;;  %v250_v50 = vld [vmem:[%s2622_s1 + $0x538] sm:$0xff] }
  0x44   :  { %764 = vmatmul.mubr.bf16.vlgmr.msra.gmra.mxu0 %v1347_v9  ;;  %v1377_v9 = vld [vmem:[%s2623_s0 + $0xf4] ss:$24 sps:$4 sm:$0xff]   ;;  %v1393_v55 = vld [vmem:[%s2623_s0 + $0x150] ss:$24 sps:$4 sm:$0xff]   ;;  %v246_v57 = vld [vmem:[%s2622_s1 + $0x518] sm:$0xff] }
  0x45   :  { %917 = vmatmul.mubr.bf16.vlgmr.msra.gmra.mxu1 %v1350_v10  ;;  %1038 = vmatpush1.bf16.msra.mxu0 %v353_v11  ;;  %v268_v10 = vld [vmem:[%s2622_s1 + $0x5c8] sm:$0xff]  ;;  %v1394_v58 = vld [vmem:[%s2623_s0 + $0x158] ss:$24 sps:$4 sm:$0xff]   ;;  %v243_v63 = vld [vmem:[%s2622_s1 + $0x500] sm:$0xff] }
  0x46   :  { %1331 = vmatpush1.bf16.msra.mxu1 %v353_v11  ;;  %1039 = vmatprep.subr.bf16.mxu0 %v352_v15  ;;  %v270_v11 = vld [vmem:[%s2622_s1 + $0x5d8] sm:$0xff]  ;;  %v244_v56 = vld [vmem:[%s2622_s1 + $0x508] sm:$0xff]  ;;  %v245_v0 = vld [vmem:[%s2622_s1 + $0x510] sm:$0xff] }
  0x47   :  { %1316 = vmatprep.subr.bf16.mxu1 %v352_v15  ;;  %773 = vmatprep.mubr.bf16.mxu0 %v1353_v12  ;;  %v1379_v12 = vld [vmem:[%s2623_s0 + $0xfc] ss:$24 sps:$4 sm:$0xff]   ;;  %v368_v15 = vpack.c.bf16 %v270_v11, %v268_v10  ;;  %v355_v1 = vpack.c.bf16 %v245_v0, %v243_v63  ;;  %v1399_v2 = vld [vmem:[%s2623_s0 + $0x180] ss:$24 sps:$4 sm:$0xff]   ;;  %v1417_v14 = vld [vmem:[%s2623_s0 + $0x210] ss:$24 sps:$4 sm:$0xff]  }
  0x48   :  { %926 = vmatprep.mubr.bf16.mxu1 %v1355_v18  ;;  %v266_v18 = vld [vmem:[%s2622_s1 + $0x5b8] sm:$0xff]  ;;  %v1412_v11 = vld [vmem:[%s2623_s0 + $0x1e8] ss:$24 sps:$4 sm:$0xff]   ;;  %v1421_v16 = vld [vmem:[%s2623_s0 + $0x14] ss:$24 sps:$4 sm:$0xff]  }
  0x49   :  { %1040 = vmatpush1.bf16.msra.mxu0 %v351_v19  ;;  %v1406_v7 = vld [vmem:[%s2623_s0 + $0x1b8] ss:$24 sps:$4 sm:$0xff]   ;;  %v1407_v8 = vld [vmem:[%s2623_s0 + $0x1e4] ss:$24 sps:$4 sm:$0xff]  }
  0x4a   :  { %1332 = vmatpush1.bf16.msra.mxu1 %v351_v19  ;;  %1041 = vmatprep.subr.bf16.mxu0 %v350_v21  ;;  %v1381_v19 = vld [vmem:[%s2623_s0 + $0xf0] ss:$24 sps:$4 sm:$0xff]   ;;  %v1411_v10 = vld [vmem:[%s2623_s0 + $0x1e0] ss:$24 sps:$4 sm:$0xff]  }
  0x4b   :  { %1317 = vmatprep.subr.bf16.mxu1 %v350_v21  ;;  %v263_v21 = vld [vmem:[%s2622_s1 + $0x5a0] sm:$0xff] }
  0x4c   :  { %774 = vmatmul.mubr.bf16.gmra.mxu0 %v1357_v23  ;;  %v366_v23 = vpack.c.bf16 %v266_v18, %v264_v17  ;;  %v1424_v17 = vld [vmem:[%s2623_s0 + $0x134] ss:$24 sps:$4 sm:$0xff]   ;;  %v1419_v18 = vld [vmem:[%s2623_s0 + $0x10] ss:$24 sps:$4 sm:$0xff]  }
  0x4d   :  { %927 = vmatmul.mubr.bf16.gmra.mxu1 %v1358_v26  ;;  %1042 = vmatpush1.bf16.msra.mxu0 %v349_v27  ;;  %v260_v26 = vld [vmem:[%s2622_s1 + $0x588] sm:$0xff] }
  0x4e   :  { %1333 = vmatpush1.bf16.msra.mxu1 %v349_v27  ;;  %783 = vmatprep.mubr.bf16.mxu0 %v1359_v28  ;;  %v262_v27 = vld [vmem:[%s2622_s1 + $0x598] sm:$0xff]  ;;  %v1385_v28 = vld [vmem:[%s2623_s0 + $0x12c] ss:$24 sps:$4 sm:$0xff]  }
  0x4f   :  { %936 = vmatprep.mubr.bf16.mxu1 %v1361_v29  ;;  %1043 = vmatprep.subr.bf16.mxu0 %v348_v33  ;;  %v365_v29 = vpack.c.bf16 %v265_v24, %v263_v21  ;;  %v364_v31 = vpack.c.bf16 %v262_v27, %v260_v26  ;;  %v1427_v21 = vld [vmem:[%s2623_s0 + $0x164] ss:$24 sps:$4 sm:$0xff]   ;;  %v1431_v24 = vld [vmem:[%s2623_s0 + $0x74] ss:$24 sps:$4 sm:$0xff]   ;;  %v1435_v26 = vld [vmem:[%s2623_s0 + $0x70] ss:$24 sps:$4 sm:$0xff]  }
  0x50   :  { %1318 = vmatprep.subr.bf16.mxu1 %v348_v33  ;;  %v256_v33 = vld [vmem:[%s2622_s1 + $0x568] sm:$0xff] }
  0x51   :  { %1044 = vmatpush1.bf16.msra.mxu0 %v347_v35  ;;  %v1436_v27 = vld [vmem:[%s2623_s0 + $0x190] ss:$24 sps:$4 sm:$0xff]  }
  0x52   :  { %1334 = vmatpush1.bf16.msra.mxu1 %v347_v35  ;;  %1045 = vmatprep.subr.bf16.mxu0 %v346_v37  ;;  %v363_v35 = vpack.c.bf16 %v261_v32, %v259_v30  ;;  %v1441_v30 = vld [vmem:[%s2623_s0 + $0xa0] ss:$24 sps:$4 sm:$0xff]   ;;  %v1443_v32 = vld [vmem:[%s2623_s0 + $0xd4] ss:$24 sps:$4 sm:$0xff]  }
  0x53   :  { %1319 = vmatprep.subr.bf16.mxu1 %v346_v37  ;;  %v362_v37 = vpack.c.bf16 %v258_v34, %v256_v33  ;;  %v1445_v33 = vld [vmem:[%s2623_s0 + $0x1f4] ss:$24 sps:$4 sm:$0xff]   ;;  %v1447_v34 = vld [vmem:[%s2623_s0 + $0xd0] ss:$24 sps:$4 sm:$0xff]  }
  0x54   :  { %784 = vmatmul.mubr.bf16.gmra.mxu0 %v1363_v36  ;;  %v255_v36 = vld [vmem:[%s2622_s1 + $0x560] sm:$0xff] }
  0x55   :  { %937 = vmatmul.mubr.bf16.gmra.mxu1 %v1364_v42  ;;  %793 = vmatprep.mubr.bf16.mxu0 %v1365_v43  ;;  %v1388_v42 = vld [vmem:[%s2623_s0 + $0x128] ss:$24 sps:$4 sm:$0xff]   ;;  %v1389_v43 = vld [vmem:[%s2623_s0 + $0x154] ss:$24 sps:$4 sm:$0xff]  }
  0x56   :  { %946 = vmatprep.mubr.bf16.mxu1 %v1367_v44  ;;  %1046 = vmatpush1.bf16.msra.mxu0 %v345_v45  ;;  %v1391_v44 = vld [vmem:[%s2623_s0 + $0x15c] ss:$24 sps:$4 sm:$0xff]  }
  0x57   :  { %1335 = vmatpush1.bf16.msra.mxu1 %v345_v45  ;;  %1047 = vmatprep.subr.bf16.mxu0 %v344_v47  ;;  %v361_v45 = vpack.c.bf16 %v257_v38, %v255_v36  ;;  %v1449_v36 = vld [vmem:[%s2623_s0 + $0x104] ss:$24 sps:$4 sm:$0xff]   ;;  %v1453_v38 = vld [vmem:[%s2623_s0 + $0x100] ss:$24 sps:$4 sm:$0xff]  }
  0x58   :  { %1320 = vmatprep.subr.bf16.mxu1 %v344_v47  ;;  %v251_v47 = vld [vmem:[%s2622_s1 + $0x540] sm:$0xff] }
  0x5a   :  { %1048 = vmatpush1.bf16.msra.mxu0 %v343_v52 }
  0x5b   :  { %1336 = vmatpush1.bf16.msra.mxu1 %v343_v52  ;;  %1049 = vmatprep.subr.bf16.mxu0 %v342_v54  ;;  %v358_v52 = vpack.c.bf16 %v250_v50, %v248_v49 }
  0x5c   :  { %794 = vmatmul.mubr.bf16.gmra.mxu0 %v1369_v51  ;;  %1321 = vmatprep.subr.bf16.mxu1 %v342_v54  ;;  %v359_v51 = vpack.c.bf16 %v253_v48, %v251_v47  ;;  %v249_v54 = vld [vmem:[%s2622_s1 + $0x530] sm:$0xff] }
  0x5d   :  { %947 = vmatmul.mubr.bf16.gmra.mxu1 %v1370_v53  ;;  %803 = vmatprep.mubr.bf16.mxu0 %v1371_v59  ;;  %v247_v53 = vld [vmem:[%s2622_s1 + $0x520] sm:$0xff] }
  0x5e   :  { %956 = vmatprep.mubr.bf16.mxu1 %v1373_v60  ;;  %1050 = vmatpush1.bf16.msra.mxu0 %v341_v61  ;;  %v1395_v59 = vld [vmem:[%s2623_s0 + $0x184] ss:$24 sps:$4 sm:$0xff]  }
  0x5f   :  { %1337 = vmatpush1.bf16.msra.mxu1 %v341_v61  ;;  %1051 = vmatprep.subr.bf16.mxu0 %v340_v62  ;;  %v1397_v60 = vld [vmem:[%s2623_s0 + $0x18c] ss:$24 sps:$4 sm:$0xff]   ;;  %v357_v61 = vpack.c.bf16 %v249_v54, %v247_v53 }
  0x60   :  { %1322 = vmatprep.subr.bf16.mxu1 %v340_v62  ;;  %v356_v62 = vpack.c.bf16 %v246_v57, %v244_v56 }
  0x62   :  { %1052 = vmatpush1.bf16.msra.mxu0 %v339_v4 }
  0x63   :  { %1338 = vmatpush1.bf16.msra.mxu1 %v339_v4  ;;  %1053 = vmatprep.subr.bf16.mxu0 %v370_v6  ;;  %v1401_v4 = vld [vmem:[%s2623_s0 + $0x1b4] ss:$24 sps:$4 sm:$0xff]  }
  0x64   :  { %804 = vmatmul.mubr.bf16.gmra.mxu0 %v1375_v3  ;;  %1323 = vmatprep.subr.bf16.mxu1 %v370_v6  ;;  %v1400_v3 = vld [vmem:[%s2623_s0 + $0x188] ss:$24 sps:$4 sm:$0xff]  }
  0x65   :  { %957 = vmatmul.mubr.bf16.gmra.mxu1 %v1376_v5  ;;  %813 = vmatprep.mubr.bf16.mxu0 %v1377_v9  ;;  %v1403_v5 = vld [vmem:[%s2623_s0 + $0x1bc] ss:$24 sps:$4 sm:$0xff]   ;;  %v1405_v6 = vld [vmem:[%s2623_s0 + $0x1b0] ss:$24 sps:$4 sm:$0xff]   ;;  %v1409_v9 = vld [vmem:[%s2623_s0 + $0x1ec] ss:$24 sps:$4 sm:$0xff]  }
  0x66   :  { %966 = vmatprep.mubr.bf16.mxu1 %v1379_v12  ;;  %1054 = vmatpush2.bf16.msra.mxu0 %v369_v13  ;;  %v1413_v12 = vld [vmem:[%s2623_s0 + $0x214] ss:$24 sps:$4 sm:$0xff]  }
  0x67   :  { %1339 = vmatpush2.bf16.msra.mxu1 %v369_v13  ;;  %1055 = vmatprep.subr.bf16.mxu0 %v368_v15  ;;  %v1415_v13 = vld [vmem:[%s2623_s0 + $0x21c] ss:$24 sps:$4 sm:$0xff]  }
  0x68   :  { %1324 = vmatprep.subr.bf16.mxu1 %v368_v15  ;;  %v1418_v15 = vld [vmem:[%s2623_s0 + $0x218] ss:$24 sps:$4 sm:$0xff]  }
  0x6a   :  { %1056 = vmatpush2.bf16.msra.mxu0 %v367_v20 }
  0x6b   :  { %1340 = vmatpush2.bf16.msra.mxu1 %v367_v20  ;;  %1057 = vmatprep.subr.bf16.mxu0 %v366_v23  ;;  %v1425_v20 = vld [vmem:[%s2623_s0 + $0x44] ss:$24 sps:$4 sm:$0xff]  }
  0x6c   :  { %814 = vmatmul.mubr.bf16.gmra.mxu0 %v1381_v19  ;;  %1325 = vmatprep.subr.bf16.mxu1 %v366_v23  ;;  %v1422_v19 = vld [vmem:[%s2623_s0 + $0x130] ss:$24 sps:$4 sm:$0xff]   ;;  %v1430_v23 = vld [vmem:[%s2623_s0 + $0x160] ss:$24 sps:$4 sm:$0xff]  }
  0x6d   :  { %967 = vmatmul.mubr.bf16.gmra.mxu1 %v1382_v22  ;;  %823 = vmatprep.mubr.bf16.mxu0 %v1383_v25  ;;  %v1429_v22 = vld [vmem:[%s2623_s0 + $0x40] ss:$24 sps:$4 sm:$0xff]   ;;  %v1433_v25 = vld [vmem:[%s2623_s0 + $0x194] ss:$24 sps:$4 sm:$0xff]  }
  0x6e   :  { %976 = vmatprep.mubr.bf16.mxu1 %v1385_v28  ;;  %1058 = vmatpush2.bf16.msra.mxu0 %v365_v29  ;;  %v1437_v28 = vld [vmem:[%s2623_s0 + $0xa4] ss:$24 sps:$4 sm:$0xff]  }
  0x6f   :  { %1341 = vmatpush2.bf16.msra.mxu1 %v365_v29  ;;  %1059 = vmatprep.subr.bf16.mxu0 %v364_v31  ;;  %v1439_v29 = vld [vmem:[%s2623_s0 + $0x1c4] ss:$24 sps:$4 sm:$0xff]  }
  0x70   :  { %1326 = vmatprep.subr.bf16.mxu1 %v364_v31  ;;  %v1442_v31 = vld [vmem:[%s2623_s0 + $0x1c0] ss:$24 sps:$4 sm:$0xff]  }
  0x72   :  { %1060 = vmatpush2.bf16.msra.mxu0 %v363_v35 }
  0x73   :  { %1342 = vmatpush2.bf16.msra.mxu1 %v363_v35  ;;  %1061 = vmatprep.subr.bf16.mxu0 %v362_v37  ;;  %v1448_v35 = vld [vmem:[%s2623_s0 + $0x1f0] ss:$24 sps:$4 sm:$0xff]  }
  0x74   :  { %824 = vmatmul.mubr.bf16.gmra.mxu0 %v1387_v39  ;;  %1327 = vmatprep.subr.bf16.mxu1 %v362_v37  ;;  %v1451_v37 = vld [vmem:[%s2623_s0 + $0x224] ss:$24 sps:$4 sm:$0xff]   ;;  %v1454_v39 = vld [vmem:[%s2623_s0 + $0x220] ss:$24 sps:$4 sm:$0xff]  }
  0x75   :  { %977 = vmatmul.mubr.bf16.gmra.mxu1 %v1388_v42  ;;  %833 = vmatprep.mubr.bf16.mxu0 %v1389_v43 }
  0x76   :  { %986 = vmatprep.mubr.bf16.mxu1 %v1391_v44  ;;  %1062 = vmatpush2.bf16.msra.mxu0 %v361_v45 }
  0x77   :  { %1343 = vmatpush2.bf16.msra.mxu1 %v361_v45  ;;  %1063 = vmatprep.subr.bf16.mxu0 %v360_v46 }
  0x78   :  { %1328 = vmatprep.subr.bf16.mxu1 %v360_v46 }
  0x7a   :  { %1064 = vmatpush2.bf16.msra.mxu0 %v359_v51 }
  0x7b   :  { %1344 = vmatpush2.bf16.msra.mxu1 %v359_v51  ;;  %1065 = vmatprep.subr.bf16.mxu0 %v358_v52 }
  0x7c   :  { %834 = vmatmul.mubr.bf16.gmra.mxu0 %v1393_v55  ;;  %1329 = vmatprep.subr.bf16.mxu1 %v358_v52 }
  0x7d   :  { %987 = vmatmul.mubr.bf16.gmra.mxu1 %v1394_v58  ;;  %843 = vmatprep.mubr.bf16.mxu0 %v1395_v59 }
  0x7e   :  { %996 = vmatprep.mubr.bf16.mxu1 %v1397_v60  ;;  %1066 = vmatpush2.bf16.msra.mxu0 %v357_v61 }
  0x7f   :  { %1345 = vmatpush2.bf16.msra.mxu1 %v357_v61  ;;  %1067 = vmatprep.subr.bf16.mxu0 %v356_v62 }
  0x80   :  { %1330 = vmatprep.subr.bf16.mxu1 %v356_v62 }
  0x82   :  { %1068 = vmatpush2.bf16.msra.mxu0 %v355_v1 }
  0x83   :  { %1346 = vmatpush2.bf16.msra.mxu1 %v355_v1 }
  0x84   :  { %844 = vmatmul.mubr.bf16.gmra.mxu0 %v1399_v2 }
  0x85   :  { %997 = vmatmul.mubr.bf16.gmra.mxu1 %v1400_v3  ;;  %853 = vmatprep.mubr.bf16.mxu0 %v1401_v4 }
  0x86   :  { %1006 = vmatprep.mubr.bf16.mxu1 %v1403_v5 }
  0x8c   :  { %854 = vmatmul.mubr.bf16.gmra.mxu0 %v1405_v6 }
  0x8d   :  { %1007 = vmatmul.mubr.bf16.gmra.mxu1 %v1406_v7  ;;  %863 = vmatprep.mubr.bf16.mxu0 %v1407_v8 }
  0x8e   :  { %1016 = vmatprep.mubr.bf16.mxu1 %v1409_v9 }
  0x94   :  { %864 = vmatmul.mubr.bf16.gmra.mxu0 %v1411_v10 }
  0x95   :  { %1017 = vmatmul.mubr.bf16.gmra.mxu1 %v1412_v11  ;;  %873 = vmatprep.mubr.bf16.mxu0 %v1413_v12 }
  0x96   :  { %1026 = vmatprep.mubr.bf16.mxu1 %v1415_v13 }
  0x9c   :  { %874 = vmatmul.mubr.bf16.gmra.mxu0 %v1417_v14 }
  0x9d   :  { %1027 = vmatmul.mubr.bf16.gmra.mxu1 %v1418_v15  ;;  %1069 = vmatprep.mubr.bf16.mxu0 %v1421_v16 }
  0x9e   :  { %1129 = vmatprep.mubr.bf16.mxu1 %v1424_v17 }
  0xa4   :  { %1070 = vmatmul.mubr.bf16.vlgmr.msra.gmra.mxu0 %v1419_v18 }
  0xa5   :  { %1130 = vmatmul.mubr.bf16.vlgmr.msra.gmra.mxu1 %v1422_v19  ;;  %1079 = vmatprep.mubr.bf16.mxu0 %v1425_v20 }
  0xa6   :  { %1139 = vmatprep.mubr.bf16.mxu1 %v1427_v21 }
  0xac   :  { %1080 = vmatmul.mubr.bf16.gmra.mxu0 %v1429_v22 }
  0xad   :  { %1140 = vmatmul.mubr.bf16.gmra.mxu1 %v1430_v23  ;;  %1089 = vmatprep.mubr.bf16.mxu0 %v1431_v24 }
  0xae   :  { %1149 = vmatprep.mubr.bf16.mxu1 %v1433_v25 }
  0xb4   :  { %1090 = vmatmul.mubr.bf16.gmra.mxu0 %v1435_v26 }
  0xb5   :  { %1150 = vmatmul.mubr.bf16.gmra.mxu1 %v1436_v27  ;;  %1099 = vmatprep.mubr.bf16.mxu0 %v1437_v28 }
  0xb6   :  { %1159 = vmatprep.mubr.bf16.mxu1 %v1439_v29 }
  0xbc   :  { %1100 = vmatmul.mubr.bf16.gmra.mxu0 %v1441_v30 }
  0xbd   :  { %1160 = vmatmul.mubr.bf16.gmra.mxu1 %v1442_v31  ;;  %1109 = vmatprep.mubr.bf16.mxu0 %v1443_v32 }
  0xbe   :  { %1169 = vmatprep.mubr.bf16.mxu1 %v1445_v33 }
  0xc4   :  { %1110 = vmatmul.mubr.bf16.gmra.mxu0 %v1447_v34 }
  0xc5   :  { %1170 = vmatmul.mubr.bf16.gmra.mxu1 %v1448_v35  ;;  %1119 = vmatprep.mubr.bf16.mxu0 %v1449_v36 }
  0xc6   :  { %1179 = vmatprep.mubr.bf16.mxu1 %v1451_v37 }
  0xcc   :  { %1120 = vmatmul.mubr.bf16.gmra.mxu0 %v1453_v38 }
  0xcd   :  { %1180 = vmatmul.mubr.bf16.gmra.mxu1 %v1454_v39 }
 0x104   :  { %v765_v40 = vpop.f32.mrf.mxu0 }
 0x105   :  { %v918_v41 = vpop.f32.mrf.mxu1 }
 0x106   :  { %v2262_v42 = vadd.f32 %v918_v41, %v765_v40  ;;  %v767_v43 = vpop.f32.mrf.mxu0 }
 0x107   :  { %v920_v44 = vpop.f32.mrf.mxu1 }
 0x108   :  { %v2264_v45 = vadd.f32 %v920_v44, %v767_v43  ;;  %v769_v46 = vpop.f32.mrf.mxu0 }
 0x109   :  { %v922_v47 = vpop.f32.mrf.mxu1 }
 0x10a   :  { %v2266_v48 = vadd.f32 %v922_v47, %v769_v46  ;;  %v771_v49 = vpop.f32.mrf.mxu0 }
 0x10b   :  { %v924_v50 = vpop.f32.mrf.mxu1 }
 0x10c   :  { %v2268_v51 = vadd.f32 %v924_v50, %v771_v49  ;;  %v775_v52 = vpop.f32.mrf.mxu0 }
 0x10d   :  { %v928_v53 = vpop.f32.mrf.mxu1 }
 0x10e   :  { %v2270_v54 = vadd.f32 %v928_v53, %v775_v52  ;;  %v777_v55 = vpop.f32.mrf.mxu0 }
 0x10f   :  { %v930_v56 = vpop.f32.mrf.mxu1 }
 0x110   :  { %v2272_v57 = vadd.f32 %v930_v56, %v777_v55  ;;  %v779_v58 = vpop.f32.mrf.mxu0 }
 0x111   :  { %v932_v59 = vpop.f32.mrf.mxu1 }
 0x112   :  { %v2274_v60 = vadd.f32 %v932_v59, %v779_v58  ;;  %v781_v61 = vpop.f32.mrf.mxu0 }
 0x113   :  { %v934_v62 = vpop.f32.mrf.mxu1 }
 0x114   :  { %v2276_v63 = vadd.f32 %v934_v62, %v781_v61  ;;  %v785_v0 = vpop.f32.mrf.mxu0 }
 0x115   :  { %v938_v1 = vpop.f32.mrf.mxu1 }
 0x116   :  { %v2278_v2 = vadd.f32 %v938_v1, %v785_v0  ;;  %v787_v3 = vpop.f32.mrf.mxu0 }
 0x117   :  { %v940_v4 = vpop.f32.mrf.mxu1 }
 0x118   :  { %v2280_v5 = vadd.f32 %v940_v4, %v787_v3  ;;  %v789_v6 = vpop.f32.mrf.mxu0 }
 0x119   :  { %v942_v7 = vpop.f32.mrf.mxu1 }
 0x11a   :  { %v2282_v8 = vadd.f32 %v942_v7, %v789_v6  ;;  %v791_v9 = vpop.f32.mrf.mxu0 }
 0x11b   :  { %v944_v10 = vpop.f32.mrf.mxu1 }
 0x11c   :  { %v2284_v11 = vadd.f32 %v944_v10, %v791_v9  ;;  %v795_v12 = vpop.f32.mrf.mxu0 }
 0x11d   :  { %v948_v13 = vpop.f32.mrf.mxu1 }
 0x11e   :  { %v2286_v14 = vadd.f32 %v948_v13, %v795_v12  ;;  %v797_v15 = vpop.f32.mrf.mxu0 }
 0x11f   :  { %v950_v16 = vpop.f32.mrf.mxu1 }
 0x120   :  { %v2288_v17 = vadd.f32 %v950_v16, %v797_v15  ;;  %v799_v18 = vpop.f32.mrf.mxu0 }
 0x121   :  { %v952_v19 = vpop.f32.mrf.mxu1 }
 0x122   :  { %v2290_v20 = vadd.f32 %v952_v19, %v799_v18  ;;  %v801_v21 = vpop.f32.mrf.mxu0 }
 0x123   :  { %v954_v22 = vpop.f32.mrf.mxu1 }
 0x124   :  { %v2292_v23 = vadd.f32 %v954_v22, %v801_v21  ;;  %v805_v24 = vpop.f32.mrf.mxu0 }
 0x125   :  { %v958_v25 = vpop.f32.mrf.mxu1 }
 0x126   :  { %v2294_v26 = vadd.f32 %v958_v25, %v805_v24  ;;  %v807_v27 = vpop.f32.mrf.mxu0 }
 0x127   :  { %v960_v28 = vpop.f32.mrf.mxu1 }
 0x128   :  { %v2296_v29 = vadd.f32 %v960_v28, %v807_v27  ;;  %v809_v30 = vpop.f32.mrf.mxu0 }
 0x129   :  { %v962_v31 = vpop.f32.mrf.mxu1 }
 0x12a   :  { %2625 = vst [vmem:[#allocation2_spill] sm:$0xff] %v2296_v29  ;;  %v2298_v32 = vadd.f32 %v962_v31, %v809_v30  ;;  %v811_v33 = vpop.f32.mrf.mxu0 }
 0x12b   :  { %v964_v34 = vpop.f32.mrf.mxu1 }
 0x12c   :  { %2626 = vst [vmem:[#allocation3_spill] sm:$0xff] %v2298_v32  ;;  %v2300_v35 = vadd.f32 %v964_v34, %v811_v33  ;;  %v815_v36 = vpop.f32.mrf.mxu0 }
 0x12d   :  { %v968_v37 = vpop.f32.mrf.mxu1 }
 0x12e   :  { %2627 = vst [vmem:[#allocation4_spill] sm:$0xff] %v2300_v35  ;;  %v2302_v38 = vadd.f32 %v968_v37, %v815_v36  ;;  %v817_v39 = vpop.f32.mrf.mxu0 }
 0x12f   :  { %v970_v40 = vpop.f32.mrf.mxu1 }
 0x130   :  { %2628 = vst [vmem:[#allocation5_spill] sm:$0xff] %v2302_v38  ;;  %v2304_v41 = vadd.f32 %v970_v40, %v817_v39  ;;  %v819_v43 = vpop.f32.mrf.mxu0 }
 0x131   :  { %v972_v44 = vpop.f32.mrf.mxu1 }
 0x132   :  { %2629 = vst [vmem:[#allocation6_spill] sm:$0xff] %v2304_v41  ;;  %v2306_v46 = vadd.f32 %v972_v44, %v819_v43  ;;  %v821_v47 = vpop.f32.mrf.mxu0 }
 0x133   :  { %v974_v49 = vpop.f32.mrf.mxu1 }
 0x134   :  { %2630 = vst [vmem:[#allocation7_spill] sm:$0xff] %v2306_v46  ;;  %v2308_v50 = vadd.f32 %v974_v49, %v821_v47  ;;  %v825_v52 = vpop.f32.mrf.mxu0 }
 0x135   :  { %v978_v53 = vpop.f32.mrf.mxu1 }
 0x136   :  { %2631 = vst [vmem:[#allocation8_spill] sm:$0xff] %v2308_v50  ;;  %v827_v55 = vpop.f32.mrf.mxu0 }
 0x137   :  { %v980_v56 = vpop.f32.mrf.mxu1 }
 0x138   :  { %v829_v58 = vpop.f32.mrf.mxu0 }
 0x139   :  { %v982_v59 = vpop.f32.mrf.mxu1 }
 0x13a   :  { %v831_v61 = vpop.f32.mrf.mxu0 }
 0x13b   :  { %v984_v62 = vpop.f32.mrf.mxu1 }
 0x13c   :  { %v2310_v0 = vpop.f32.mrf.mxu0 }
 0x13d   :  { %v2312_v1 = vpop.f32.mrf.mxu1 }
 0x13e   :  { %v2314_v3 = vpop.f32.mrf.mxu0 }
 0x13f   :  { %v2316_v4 = vpop.f32.mrf.mxu1 }
 0x140   :  { %v2318_v6 = vpop.f32.mrf.mxu0 }
 0x141   :  { %v2320_v7 = vpop.f32.mrf.mxu1 }
 0x142   :  { %v2322_v9 = vpop.f32.mrf.mxu0 }
 0x143   :  { %v2324_v10 = vpop.f32.mrf.mxu1 }
 0x144   :  { %v2326_v12 = vpop.f32.mrf.mxu0 }
 0x145   :  { %v2328_v13 = vpop.f32.mrf.mxu1 }
 0x146   :  { %v2330_v15 = vpop.f32.mrf.mxu0 }
 0x147   :  { %v2332_v16 = vpop.f32.mrf.mxu1 }
 0x148   :  { %v2334_v18 = vpop.f32.mrf.mxu0 }
 0x149   :  { %v2336_v19 = vpop.f32.mrf.mxu1 }
 0x14a   :  { %v2338_v21 = vpop.f32.mrf.mxu0 }
 0x14b   :  { %v2340_v22 = vpop.f32.mrf.mxu1 }
 0x14c   :  { %v2342_v24 = vpop.f32.mrf.mxu0 }
 0x14d   :  { %v2344_v25 = vpop.f32.mrf.mxu1 }
 0x14e   :  { %v2346_v27 = vpop.f32.mrf.mxu0 }
 0x14f   :  { %v2348_v28 = vpop.f32.mrf.mxu1 }
 0x150   :  { %v2350_v30 = vpop.f32.mrf.mxu0 }
 0x151   :  { %v2352_v31 = vpop.f32.mrf.mxu1 }
 0x152   :  { %v2354_v33 = vpop.f32.mrf.mxu0 }
 0x153   :  { %v2356_v34 = vpop.f32.mrf.mxu1 }
 0x154   :  { %v2358_v36 = vpop.f32.mrf.mxu0 }
 0x155   :  { %v2360_v37 = vpop.f32.mrf.mxu1 }
 0x156   :  { %v2362_v39 = vpop.f32.mrf.mxu0 }
 0x157   :  { %2632 = vst [vmem:[#allocation9_spill] sm:$0xff] %v2362_v39  ;;  %v2364_v40 = vpop.f32.mrf.mxu1 }
 0x158   :  { %2633 = vst [vmem:[#allocation10_spill] sm:$0xff] %v2364_v40  ;;  %v2366_v43 = vpop.f32.mrf.mxu0 }
 0x159   :  { %2634 = vst [vmem:[#allocation11_spill] sm:$0xff] %v2366_v43  ;;  %v2368_v44 = vpop.f32.mrf.mxu1 }
 0x15a   :  { %2635 = vst [vmem:[#allocation12_spill] sm:$0xff] %v2368_v44  ;;  %v2370_v47 = vpop.f32.mrf.mxu0  ;;  %v979_v44 = vadd.f32 %v978_v53, %v825_v52 }
 0x15b   :  { %2636 = vst [vmem:[#allocation13_spill] sm:$0xff] %v2370_v47  ;;  %v2372_v49 = vpop.f32.mrf.mxu1 }
 0x15c   :  { %2637 = vst [vmem:[#allocation14_spill] sm:$0xff] %v2372_v49  ;;  %v2374_v50 = vpop.f32.mrf.mxu0 }
 0x15d   :  { %2638 = vst [vmem:[#allocation15_spill] sm:$0xff] %v2374_v50  ;;  %v2376_v46 = vpop.f32.mrf.mxu1  ;;  %v981_v50 = vadd.f32 %v980_v56, %v827_v55  ;;  %v985_v56 = vadd.f32 %v984_v62, %v831_v61 }
 0x15e   :  { %2639 = vst [vmem:[#allocation16_spill] sm:$0xff] %v2376_v46  ;;  %v2378_v41 = vpop.f32.mrf.mxu0 }
 0x15f   :  { %v2380_v38 = vpop.f32.mrf.mxu1 }
 0x160   :  { %2640 = vst [vmem:[#allocation17_spill] sm:$0xff] %v2380_v38  ;;  %v2382_v35 = vpop.f32.mrf.mxu0  ;;  %v983_v38 = vadd.f32 %v982_v59, %v829_v58 }
 0x161   :  { %2641 = vst [vmem:[#allocation18_spill] sm:$0xff] %v2382_v35  ;;  %v2384_v32 = vpop.f32.mrf.mxu1 }
 0x162   :  { %2642 = vst [vmem:[#allocation19_spill] sm:$0xff] %v2384_v32  ;;  %v2386_v29 = vpop.f32.mrf.mxu0 }
 0x163   :  { %v2388_v43 = vpop.f32.mrf.mxu1 }
 0x164   :  { %v1071_v47 = vpop.f32.mrf.mxu0 }
 0x165   :  { %v1072_v49 = vadd.f32 %v1071_v47, %v2262_v42  ;;  %v1131_v40 = vpop.f32.mrf.mxu1 }
 0x166   :  { %v1132_v39 = vadd.f32 %v1131_v40, %v979_v44  ;;  %v1073_v46 = vpop.f32.mrf.mxu0 }
 0x167   :  { %1190 = vst [vmem:[%s2624_s2] sm:$0xff] %v1072_v49  ;;  %v1074_v35 = vadd.f32 %v1073_v46, %v2264_v45  ;;  %v1133_v32 = vpop.f32.mrf.mxu1 }
 0x168   :  { %1215 = vst [vmem:[%s2624_s2 + $0xc0] sm:$0xff] %v1132_v39  ;;  %v1134_v52 = vadd.f32 %v1133_v32, %v981_v50  ;;  %v1075_v53 = vpop.f32.mrf.mxu0 }
 0x169   :  { %1192 = vst.msk [vmem:[%s2624_s2 + $0x8] sm:$0xff] %vm1191_vm0, %v1074_v35  ;;  %v1076_v42 = vadd.f32 %v1075_v53, %v2266_v48  ;;  %v1135_v55 = vpop.f32.mrf.mxu1  ;;  %v989_v35 = vadd.f32 %v2312_v1, %v2310_v0 }
 0x16a   :  { %1216 = vst.msk [vmem:[%s2624_s2 + $0xc8] sm:$0xff] %vm1191_vm0, %v1134_v52  ;;  %v1136_v45 = vadd.f32 %v1135_v55, %v983_v38  ;;  %v1077_v46 = vpop.f32.mrf.mxu0 }
 0x16b   :  { %1193 = vst [vmem:[%s2624_s2 + $0x10] sm:$0xff] %v1076_v42  ;;  %v1078_v32 = vadd.f32 %v1077_v46, %v2268_v51  ;;  %v1137_v50 = vpop.f32.mrf.mxu1  ;;  %v991_v51 = vadd.f32 %v2316_v4, %v2314_v3 }
 0x16c   :  { %1217 = vst [vmem:[%s2624_s2 + $0xd0] sm:$0xff] %v1136_v45  ;;  %v1138_v48 = vadd.f32 %v1137_v50, %v985_v56  ;;  %v1081_v58 = vpop.f32.mrf.mxu0 }
 0x16d   :  { %1194 = vst.msk [vmem:[%s2624_s2 + $0x18] sm:$0xff] %vm1191_vm0, %v1078_v32  ;;  %v1082_v38 = vadd.f32 %v1081_v58, %v2270_v54  ;;  %v1141_v59 = vpop.f32.mrf.mxu1  ;;  %v993_v54 = vadd.f32 %v2320_v7, %v2318_v6 }
 0x16e   :  { %1218 = vst.msk [vmem:[%s2624_s2 + $0xd8] sm:$0xff] %vm1191_vm0, %v1138_v48  ;;  %v1142_v61 = vadd.f32 %v1141_v59, %v989_v35  ;;  %v1083_v62 = vpop.f32.mrf.mxu0 }
 0x16f   :  { %1195 = vst [vmem:[%s2624_s2 + $0x20] sm:$0xff] %v1082_v38  ;;  %v1084_v0 = vadd.f32 %v1083_v62, %v2272_v57  ;;  %v1143_v1 = vpop.f32.mrf.mxu1  ;;  %v995_v57 = vadd.f32 %v2324_v10, %v2322_v9 }
 0x170   :  { %1219 = vst [vmem:[%s2624_s2 + $0xe0] sm:$0xff] %v1142_v61  ;;  %v1144_v3 = vadd.f32 %v1143_v1, %v991_v51  ;;  %v1085_v4 = vpop.f32.mrf.mxu0 }
 0x171   :  { %1196 = vst.msk [vmem:[%s2624_s2 + $0x28] sm:$0xff] %vm1191_vm0, %v1084_v0  ;;  %v1086_v39 = vadd.f32 %v1085_v4, %v2274_v60  ;;  %v1145_v40 = vpop.f32.mrf.mxu1  ;;  %v999_v60 = vadd.f32 %v2328_v13, %v2326_v12  ;;  %v2643_v0 = vld [vmem:[#allocation9_spill] sm:$0xff] }
 0x172   :  { %1220 = vst.msk [vmem:[%s2624_s2 + $0xe8] sm:$0xff] %vm1191_vm0, %v1144_v3  ;;  %v1146_v6 = vadd.f32 %v1145_v40, %v993_v54  ;;  %v1087_v7 = vpop.f32.mrf.mxu0  ;;  %v2645_v54 = vld [vmem:[#allocation2_spill] sm:$0xff] }
 0x173   :  { %1197 = vst [vmem:[%s2624_s2 + $0x30] sm:$0xff] %v1086_v39  ;;  %v1088_v44 = vadd.f32 %v1087_v7, %v2276_v63  ;;  %v1147_v47 = vpop.f32.mrf.mxu1  ;;  %v1001_v63 = vadd.f32 %v2332_v16, %v2330_v15  ;;  %v2646_v39 = vld [vmem:[#allocation11_spill] sm:$0xff] }
 0x174   :  { %1221 = vst [vmem:[%s2624_s2 + $0xf0] sm:$0xff] %v1146_v6  ;;  %v1148_v9 = vadd.f32 %v1147_v47, %v995_v57  ;;  %v1091_v10 = vpop.f32.mrf.mxu0  ;;  %v2648_v7 = vld [vmem:[#allocation3_spill] sm:$0xff] }
 0x175   :  { %1198 = vst.msk [vmem:[%s2624_s2 + $0x38] sm:$0xff] %vm1191_vm0, %v1088_v44  ;;  %v1092_v49 = vadd.f32 %v1091_v10, %v2278_v2  ;;  %v1151_v52 = vpop.f32.mrf.mxu1  ;;  %v1003_v2 = vadd.f32 %v2336_v19, %v2334_v18 }
 0x176   :  { %1222 = vst.msk [vmem:[%s2624_s2 + $0xf8] sm:$0xff] %vm1191_vm0, %v1148_v9  ;;  %v1152_v12 = vadd.f32 %v1151_v52, %v999_v60  ;;  %v1093_v13 = vpop.f32.mrf.mxu0  ;;  %v2649_v60 = vld [vmem:[#allocation13_spill] sm:$0xff]  ;;  %v2650_v9 = vld [vmem:[#allocation14_spill] sm:$0xff] }
 0x177   :  { %1199 = vst [vmem:[%s2624_s2 + $0x40] sm:$0xff] %v1092_v49  ;;  %v1094_v53 = vadd.f32 %v1093_v13, %v2280_v5  ;;  %v1153_v42 = vpop.f32.mrf.mxu1  ;;  %v1005_v5 = vadd.f32 %v2340_v22, %v2338_v21  ;;  %v1025_v10 = vadd.f32 %v2650_v9, %v2649_v60 }
 0x178   :  { %1223 = vst [vmem:[%s2624_s2 + $0x100] sm:$0xff] %v1152_v12  ;;  %v1154_v15 = vadd.f32 %v1153_v42, %v1001_v63  ;;  %v1095_v16 = vpop.f32.mrf.mxu0  ;;  %v2651_v63 = vld [vmem:[#allocation4_spill] sm:$0xff] }
 0x179   :  { %1200 = vst.msk [vmem:[%s2624_s2 + $0x48] sm:$0xff] %vm1191_vm0, %v1094_v53  ;;  %v1096_v55 = vadd.f32 %v1095_v16, %v2282_v8  ;;  %v1155_v56 = vpop.f32.mrf.mxu1  ;;  %v1009_v8 = vadd.f32 %v2344_v25, %v2342_v24  ;;  %v2652_v53 = vld [vmem:[#allocation15_spill] sm:$0xff]  ;;  %v2653_v42 = vld [vmem:[#allocation16_spill] sm:$0xff] }
 0x17a   :  { %1224 = vst.msk [vmem:[%s2624_s2 + $0x108] sm:$0xff] %vm1191_vm0, %v1154_v15  ;;  %v1156_v18 = vadd.f32 %v1155_v56, %v1003_v2  ;;  %v1097_v19 = vpop.f32.mrf.mxu0  ;;  %v1029_v2 = vadd.f32 %v2653_v42, %v2652_v53 }
 0x17b   :  { %1201 = vst [vmem:[%s2624_s2 + $0x50] sm:$0xff] %v1096_v55  ;;  %v1098_v45 = vadd.f32 %v1097_v19, %v2284_v11  ;;  %v1157_v46 = vpop.f32.mrf.mxu1  ;;  %v1011_v11 = vadd.f32 %v2348_v28, %v2346_v27  ;;  %v2654_v55 = vld [vmem:[#allocation5_spill] sm:$0xff] }
 0x17c   :  { %1225 = vst [vmem:[%s2624_s2 + $0x110] sm:$0xff] %v1156_v18  ;;  %v1158_v21 = vadd.f32 %v1157_v46, %v1005_v5  ;;  %v1101_v22 = vpop.f32.mrf.mxu0  ;;  %v2655_v18 = vld [vmem:[#allocation17_spill] sm:$0xff] }
 0x17d   :  { %1202 = vst.msk [vmem:[%s2624_s2 + $0x58] sm:$0xff] %vm1191_vm0, %v1098_v45  ;;  %v1102_v32 = vadd.f32 %v1101_v22, %v2286_v14  ;;  %v1161_v50 = vpop.f32.mrf.mxu1  ;;  %v1013_v14 = vadd.f32 %v2352_v31, %v2350_v30  ;;  %v1031_v19 = vadd.f32 %v2655_v18, %v2378_v41 }
 0x17e   :  { %1226 = vst.msk [vmem:[%s2624_s2 + $0x118] sm:$0xff] %vm1191_vm0, %v1158_v21  ;;  %v1162_v24 = vadd.f32 %v1161_v50, %v1009_v8  ;;  %v1103_v25 = vpop.f32.mrf.mxu0  ;;  %v2656_v8 = vld [vmem:[#allocation6_spill] sm:$0xff]  ;;  %v2658_v50 = vld [vmem:[#allocation19_spill] sm:$0xff] }
 0x17f   :  { %1203 = vst [vmem:[%s2624_s2 + $0x60] sm:$0xff] %v1102_v32  ;;  %v1104_v35 = vadd.f32 %v1103_v25, %v2288_v17  ;;  %v1163_v48 = vpop.f32.mrf.mxu1  ;;  %v1015_v17 = vadd.f32 %v2356_v34, %v2354_v33  ;;  %v2657_v32 = vld [vmem:[#allocation18_spill] sm:$0xff]  ;;  %v2659_v25 = vld [vmem:[#allocation7_spill] sm:$0xff] }
 0x180   :  { %1227 = vst [vmem:[%s2624_s2 + $0x120] sm:$0xff] %v1162_v24  ;;  %v1164_v27 = vadd.f32 %v1163_v48, %v1011_v11  ;;  %v1105_v28 = vpop.f32.mrf.mxu0  ;;  %v1033_v11 = vadd.f32 %v2658_v50, %v2657_v32 }
 0x181   :  { %1204 = vst.msk [vmem:[%s2624_s2 + $0x68] sm:$0xff] %vm1191_vm0, %v1104_v35  ;;  %v1106_v58 = vadd.f32 %v1105_v28, %v2290_v20  ;;  %v1165_v38 = vpop.f32.mrf.mxu1  ;;  %v1019_v20 = vadd.f32 %v2360_v37, %v2358_v36 }
 0x182   :  { %1228 = vst.msk [vmem:[%s2624_s2 + $0x128] sm:$0xff] %vm1191_vm0, %v1164_v27  ;;  %v1166_v30 = vadd.f32 %v1165_v38, %v1013_v14  ;;  %v1107_v31 = vpop.f32.mrf.mxu0  ;;  %v1035_v14 = vadd.f32 %v2388_v43, %v2386_v29 }
 0x183   :  { %1205 = vst [vmem:[%s2624_s2 + $0x70] sm:$0xff] %v1106_v58  ;;  %v1108_v59 = vadd.f32 %v1107_v31, %v2292_v23  ;;  %v1167_v51 = vpop.f32.mrf.mxu1  ;;  %v2644_v23 = vld [vmem:[#allocation10_spill] sm:$0xff]  ;;  %v2660_v58 = vld [vmem:[#allocation8_spill] sm:$0xff] }
 0x184   :  { %1229 = vst [vmem:[%s2624_s2 + $0x130] sm:$0xff] %v1166_v30  ;;  %v1168_v33 = vadd.f32 %v1167_v51, %v1015_v17  ;;  %v1111_v34 = vpop.f32.mrf.mxu0  ;;  %v1021_v1 = vadd.f32 %v2644_v23, %v2643_v0 }
 0x185   :  { %1206 = vst.msk [vmem:[%s2624_s2 + $0x78] sm:$0xff] %vm1191_vm0, %v1108_v59  ;;  %v1112_v61 = vadd.f32 %v1111_v34, %v2294_v26  ;;  %v1171_v62 = vpop.f32.mrf.mxu1  ;;  %v2647_v26 = vld [vmem:[#allocation12_spill] sm:$0xff] }
 0x186   :  { %1230 = vst.msk [vmem:[%s2624_s2 + $0x138] sm:$0xff] %vm1191_vm0, %v1168_v33  ;;  %v1172_v36 = vadd.f32 %v1171_v62, %v1019_v20  ;;  %v1113_v37 = vpop.f32.mrf.mxu0  ;;  %v1023_v40 = vadd.f32 %v2647_v26, %v2646_v39 }
 0x187   :  { %1207 = vst [vmem:[%s2624_s2 + $0x80] sm:$0xff] %v1112_v61  ;;  %v1114_v3 = vadd.f32 %v1113_v37, %v2645_v54  ;;  %v1173_v4 = vpop.f32.mrf.mxu1 }
 0x188   :  { %1231 = vst [vmem:[%s2624_s2 + $0x140] sm:$0xff] %v1172_v36  ;;  %v1174_v57 = vadd.f32 %v1173_v4, %v1021_v1  ;;  %v1115_v6 = vpop.f32.mrf.mxu0 }
 0x189   :  { %1208 = vst.msk [vmem:[%s2624_s2 + $0x88] sm:$0xff] %vm1191_vm0, %v1114_v3  ;;  %v1116_v44 = vadd.f32 %v1115_v6, %v2648_v7  ;;  %v1175_v47 = vpop.f32.mrf.mxu1 }
 0x18a   :  { %1232 = vst.msk [vmem:[%s2624_s2 + $0x148] sm:$0xff] %vm1191_vm0, %v1174_v57  ;;  %v1176_v49 = vadd.f32 %v1175_v47, %v1023_v40  ;;  %v1117_v52 = vpop.f32.mrf.mxu0 }
 0x18b   :  { %1209 = vst [vmem:[%s2624_s2 + $0x90] sm:$0xff] %v1116_v44  ;;  %v1118_v12 = vadd.f32 %v1117_v52, %v2651_v63  ;;  %v1177_v13 = vpop.f32.mrf.mxu1 }
 0x18c   :  { %1233 = vst [vmem:[%s2624_s2 + $0x150] sm:$0xff] %v1176_v49  ;;  %v1178_v15 = vadd.f32 %v1177_v13, %v1025_v10  ;;  %v1121_v16 = vpop.f32.mrf.mxu0 }
 0x18d   :  { %1210 = vst.msk [vmem:[%s2624_s2 + $0x98] sm:$0xff] %vm1191_vm0, %v1118_v12  ;;  %v1122_v56 = vadd.f32 %v1121_v16, %v2654_v55  ;;  %v1181_v5 = vpop.f32.mrf.mxu1 }
 0x18e   :  { %1234 = vst.msk [vmem:[%s2624_s2 + $0x158] sm:$0xff] %vm1191_vm0, %v1178_v15  ;;  %v1182_v45 = vadd.f32 %v1181_v5, %v1029_v2  ;;  %v1123_v46 = vpop.f32.mrf.mxu0 }
 0x18f   :  { %1211 = vst [vmem:[%s2624_s2 + $0xa0] sm:$0xff] %v1122_v56  ;;  %v1124_v21 = vadd.f32 %v1123_v46, %v2656_v8  ;;  %v1183_v22 = vpop.f32.mrf.mxu1 }
 0x190   :  { %1235 = vst [vmem:[%s2624_s2 + $0x160] sm:$0xff] %v1182_v45  ;;  %v1184_v41 = vadd.f32 %v1183_v22, %v1031_v19  ;;  %v1125_v24 = vpop.f32.mrf.mxu0 }
 0x191   :  { %1212 = vst.msk [vmem:[%s2624_s2 + $0xa8] sm:$0xff] %vm1191_vm0, %v1124_v21  ;;  %v1126_v35 = vadd.f32 %v1125_v24, %v2659_v25  ;;  %v1185_v48 = vpop.f32.mrf.mxu1 }
 0x192   :  { %1236 = vst.msk [vmem:[%s2624_s2 + $0x168] sm:$0xff] %vm1191_vm0, %v1184_v41  ;;  %v1186_v27 = vadd.f32 %v1185_v48, %v1033_v11  ;;  %v1127_v28 = vpop.f32.mrf.mxu0 }
 0x193   :  { %1213 = vst [vmem:[%s2624_s2 + $0xb0] sm:$0xff] %v1126_v35  ;;  %v1128_v38 = vadd.f32 %v1127_v28, %v2660_v58  ;;  %v1187_v17 = vpop.f32.mrf.mxu1 }
 0x194   :  { %1237 = vst [vmem:[%s2624_s2 + $0x170] sm:$0xff] %v1186_v27  ;;  %v1188_v30 = vadd.f32 %v1187_v17, %v1035_v14 }
 0x195   :  { %1214 = vst.msk [vmem:[%s2624_s2 + $0xb8] sm:$0xff] %vm1191_vm0, %v1128_v38 }
 0x196   :  { %1238 = vst.msk [vmem:[%s2624_s2 + $0x178] sm:$0xff] %vm1191_vm0, %v1188_v30 }

</bundles_post_ra>
